<compile_context>
chip_gen: v6e
topology: v6e:2x2x1
jax: 0.10.0
libtpu: 0.0.40
codegen_flags: <defaults>
</compile_context>

<pallas_src>
import functools
from typing import NamedTuple

import jax
import jax.numpy as jnp
from jax.experimental import pallas as pl
from jax.experimental.pallas import tpu as pltpu


_SQRT_HALF = 0.7071067811865476


def _round_up(x, n):
    return ((x + n - 1) // n) * n


def _vmem_capacity_bytes():
    cap = None
    try:
        info = pltpu.get_tpu_info()
        cap = int(getattr(info, "vmem_capacity_bytes", 0)) or None
    except Exception:
        cap = None
    if cap is None:
        cap = 64 * 1024 * 1024  # conservative fallback (v7x per-TC VMEM)
    try:
        kind = jax.devices()[0].device_kind.lower()
        if "v7" in kind:  # belt-and-braces: never budget past v7x's per-TC VMEM
            cap = min(cap, 64 * 1024 * 1024)
    except Exception:
        pass
    return cap


def _num_tensorcores():
    try:
        kind = jax.devices()[0].device_kind.lower()
        return 2 if "v7" in kind else 1
    except Exception:
        return 1


class FFNConfig(NamedTuple):
    tn: int             # hidden-dim tile (reduction K of the 2nd matmul)
    tm_cap: int         # max token tile the VMEM budget allows
    compute_dtype: str  # MXU operand dtype (f32 accumulation always)
    approx_gelu: bool   # tanh-approx GELU (EUP) instead of exact erf
    vmem_limit: int     # scoped VMEM limit handed to the compiler


def _choose_tiles(dim, hidden, c_itemsize, budget):
    """Pick (tm_cap, tn) so the double-buffered working set fits `budget`."""
    hidden128 = _round_up(hidden, 128)
    tm = 512 if budget >= 96 * (1 << 20) else 256
    while True:
        fixed = (
            2 * tm * dim * 4          # double-buffered x tile (assume f32)
            + 2 * tm * dim * 4        # double-buffered out tile (assume f32)
            + tm * dim * 4            # f32 accumulator (worst case: not fused)
            + 2 * dim * 4             # b2
            + (1 << 20)               # slack: b1 tile, compiler scratch, sems
        )
        per_tn = 2 * 2 * dim * c_itemsize + 2 * 8 * 4  # W1 + W2 (2 bufs) + b1
        avail = budget - fixed
        tn_max = avail // per_tn if avail > 0 else 0
        if hidden128 <= tn_max:
            return tm, hidden128                    # whole hidden fits per step
        if tn_max >= 256:
            return tm, (tn_max // 256) * 256        # MXU-depth multiple
        if tn_max >= 128:
            return tm, 128
        if tm <= 8:
            return 8, 128                           # last resort
        tm = max(8, tm // 2)


def prepare_ffn_params(w1, b1, w2, b2, *, compute_dtype=jnp.bfloat16,
                       approx_gelu=False):
    """Cast + pad the FFN parameters ONCE, outside the per-call hot path.

    w1: (dim, hidden)  b1: (hidden,)  w2: (hidden, dim)  b2: (dim,)
    (W1/W2 are stored transposed relative to torch.nn.Linear.weight.)
    """
    dim, hidden = w1.shape
    assert w2.shape == (hidden, dim)
    assert b1.shape == (hidden,) and b2.shape == (dim,)

    c_itemsize = jnp.dtype(compute_dtype).itemsize
    capacity = _vmem_capacity_bytes()
    budget = int(capacity * 0.75)        # headroom: ~48 MiB on v7x, ~96 MiB v6e
    tm_cap, tn = _choose_tiles(dim, hidden, c_itemsize, budget)
    hidden_pad = _round_up(hidden, tn)

    # Zero-padded hidden columns/rows contribute exactly 0 (gelu(0)=0, W2 rows 0).
    w1p = jnp.zeros((dim, hidden_pad), compute_dtype).at[:, :hidden].set(
        w1.astype(compute_dtype))
    w2p = jnp.zeros((hidden_pad, dim), compute_dtype).at[:hidden, :].set(
        w2.astype(compute_dtype))
    b1p = jnp.zeros((1, hidden_pad), jnp.float32).at[0, :hidden].set(
        b1.astype(jnp.float32))
    b2p = b2.reshape(1, dim).astype(jnp.float32)

    cfg = FFNConfig(
        tn=int(tn),
        tm_cap=int(tm_cap),
        compute_dtype=jnp.dtype(compute_dtype).name,
        approx_gelu=bool(approx_gelu),
        vmem_limit=int(capacity * 0.9),
    )
    return (w1p, b1p, w2p, b2p), cfg


def _ffn_kernel(x_ref, w1_ref, b1_ref, w2_ref, b2_ref, o_ref, *scratch,
                compute_dtype, acc_in_output, approx_gelu):
    # x_ref:  (tm, dim)  [x dtype]     w1_ref: (dim, tn)   b1_ref: (1, tn) f32
    # w2_ref: (tn, dim)                b2_ref: (1, dim) f32
    # o_ref:  (tm, dim)  [x dtype]     scratch: optional (tm, dim) f32 accumulator
    acc_ref = o_ref if acc_in_output else scratch[0]
    k = pl.program_id(1)

    @pl.when(k == 0)
    def _():
        acc_ref[...] = jnp.zeros_like(acc_ref)

    # Cast x in-kernel: the tile is DMA'd in its original dtype, so the wrapper
    # never burns an extra HBM pass just to change dtype.
    x = x_ref[...].astype(compute_dtype)
    h = jnp.dot(x, w1_ref[...], preferred_element_type=jnp.float32)
    h = h + b1_ref[...]

    if approx_gelu:
        # tanh approximation lands on the (otherwise idle) EUP slot.
        h = jax.nn.gelu(h, approximate=True)
    else:
        # Exact erf GELU (matches torch.nn.GELU default), computed in f32.
        h = 0.5 * h * (1.0 + jax.lax.erf(h * jnp.float32(_SQRT_HALF)))

    # Dropout(p=0.0) is the identity (eval semantics).
    # TODO(synk): stochastic dropout via pltpu.prng_random_bits if p > 0 is needed.

    acc_ref[...] += jnp.dot(h.astype(compute_dtype), w2_ref[...],
                            preferred_element_type=jnp.float32)

    @pl.when(k == pl.num_programs(1) - 1)
    def _():
        o_ref[...] = (acc_ref[...] + b2_ref[...]).astype(o_ref.dtype)


@functools.partial(jax.jit, static_argnames=("cfg",))
def feed_forward(x, w1p, b1p, w2p, b2p, *, cfg):
    """x: (batch, seq, dim) -> (batch, seq, dim). Params from prepare_ffn_params."""
    batch, seq, dim = x.shape
    hidden_pad = w1p.shape[1]
    tn = cfg.tn
    compute_dtype = jnp.dtype(cfg.compute_dtype)
    out_dtype = x.dtype
    # f32 output: accumulate directly in the resident output block (no scratch).
    acc_in_output = jnp.dtype(out_dtype) == jnp.dtype(jnp.float32)

    m = batch * seq
    tm = min(cfg.tm_cap, _round_up(m, 8))
    # v7x: 2 TensorCores share the "parallel" grid axis — make sure both get work.
    num_tc = _num_tensorcores()
    if num_tc > 1 and m > 8 and -(-m // tm) < num_tc:
        tm = _round_up(-(-m // num_tc), 8)
    m_pad = _round_up(m, tm)

    x2d = x.reshape(m, dim)
    if m_pad != m:
        x2d = jnp.pad(x2d, ((0, m_pad - m), (0, 0)))

    csize = jnp.dtype(compute_dtype).itemsize
    xsize = jnp.dtype(x.dtype).itemsize
    osize = jnp.dtype(out_dtype).itemsize
    num_m_tiles = m_pad // tm
    num_k_tiles = hidden_pad // tn

    cost = pl.CostEstimate(
        flops=4 * m_pad * dim * hidden_pad,               # two matmuls
        transcendentals=m_pad * hidden_pad,               # erf / tanh
        bytes_accessed=(
            m_pad * dim * xsize                           # x
            + num_m_tiles * dim * hidden_pad * csize      # W1, re-streamed per token tile
            + num_m_tiles * hidden_pad * dim * csize      # W2, re-streamed per token tile
            + num_m_tiles * (hidden_pad + dim) * 4        # biases
            + m_pad * dim * osize                         # out
        ),
    )

    kernel = functools.partial(
        _ffn_kernel,
        compute_dtype=compute_dtype,
        acc_in_output=acc_in_output,
        approx_gelu=cfg.approx_gelu,
    )
    scratch_shapes = [] if acc_in_output else [pltpu.VMEM((tm, dim), jnp.float32)]

    out = pl.pallas_call(
        kernel,
        out_shape=jax.ShapeDtypeStruct((m_pad, dim), out_dtype),
        grid_spec=pltpu.PrefetchScalarGridSpec(
            num_scalar_prefetch=0,
            grid=(num_m_tiles, num_k_tiles),
            in_specs=[
                pl.BlockSpec((tm, dim), lambda i, k: (i, 0)),   # x token tile
                pl.BlockSpec((dim, tn), lambda i, k: (0, k)),   # W1 hidden-tile
                pl.BlockSpec((1, tn), lambda i, k: (0, k)),     # b1 hidden-tile
                pl.BlockSpec((tn, dim), lambda i, k: (k, 0)),   # W2 hidden-tile
                pl.BlockSpec((1, dim), lambda i, k: (0, 0)),    # b2
            ],
            out_specs=pl.BlockSpec((tm, dim), lambda i, k: (i, 0)),
            scratch_shapes=scratch_shapes,
        ),
        compiler_params=pltpu.CompilerParams(
            dimension_semantics=("parallel", "arbitrary"),
            vmem_limit_bytes=cfg.vmem_limit,
        ),
        cost_estimate=cost,
    )(x2d, w1p, b1p, w2p, b2p)

    return out[:m].reshape(batch, seq, dim)


def _reference(x, w1, b1, w2, b2):
    h = jnp.dot(x, w1) + b1
    h = 0.5 * h * (1.0 + jax.lax.erf(h / jnp.sqrt(2.0)))
    return jnp.dot(h, w2) + b2


if __name__ == "__main__":
    # Small shapes consistent with the module: tokens of width `dim`.
    batch, seq, dim, hidden = 2, 8, 32, 64

    key = jax.random.PRNGKey(0)
    kx, kw1, kb1, kw2, kb2 = jax.random.split(key, 5)

    x = jax.random.normal(kx, (batch, seq, dim), dtype=jnp.float32)
    # PyTorch Linear(dim, hidden) stores W:[hidden, dim]; we keep the transpose
    # so the kernel multiplies row-major directly.
    w1 = jax.random.normal(kw1, (dim, hidden), dtype=jnp.float32) * 0.05
    b1 = jax.random.normal(kb1, (hidden,), dtype=jnp.float32) * 0.05
    w2 = jax.random.normal(kw2, (hidden, dim), dtype=jnp.float32) * 0.05
    b2 = jax.random.normal(kb2, (dim,), dtype=jnp.float32) * 0.05

    ref = _reference(x, w1, b1, w2, b2)

    # Exact-parity path (f32 MXU operands).
    params_f32, cfg_f32 = prepare_ffn_params(w1, b1, w2, b2, compute_dtype=jnp.float32)
    out_f32 = jax.block_until_ready(feed_forward(x, *params_f32, cfg=cfg_f32))
    assert out_f32.shape == (batch, seq, dim)
    assert jnp.allclose(out_f32, ref, atol=1e-5, rtol=1e-5), "f32 mismatch vs reference"

    # Fast path: bf16 MXU operands (f32 accumulation); weights cast/padded once.
    params_bf16, cfg_bf16 = prepare_ffn_params(w1, b1, w2, b2, compute_dtype=jnp.bfloat16)
    out_bf16 = jax.block_until_ready(feed_forward(x, *params_bf16, cfg=cfg_bf16))
    assert out_bf16.shape == (batch, seq, dim)
    assert jnp.allclose(out_bf16, ref, atol=3e-2, rtol=3e-2), "bf16 mismatch vs reference"

    print("KERNEL_OK")
</pallas_src>

<mosaic_0001>
module attributes {stable_mosaic.version = 11 : i64} {
  func.func @_ffn_kernel(%arg0: i32, %arg1: i32, %arg2: memref<16x32xf32, #tpu.memory_space<vmem>>, %arg3: memref<32x128xf32, #tpu.memory_space<vmem>>, %arg4: memref<1x128xf32, #tpu.memory_space<vmem>>, %arg5: memref<128x32xf32, #tpu.memory_space<vmem>>, %arg6: memref<1x32xf32, #tpu.memory_space<vmem>>, %arg7: memref<16x32xf32, #tpu.memory_space<vmem>>) attributes {dimension_semantics = [#tpu.dimension_semantics<parallel>, #tpu.dimension_semantics<arbitrary>], iteration_bounds = array<i64: 1, 1>, scalar_prefetch = 0 : i64, scratch_operands = 0 : i64, tpu.core_type = #tpu.core_type<tc>, window_params = [{transform_indices = @transform_0, window_bounds = array<i64: 16, 32>}, {transform_indices = @transform_1, window_bounds = array<i64: 32, 128>}, {transform_indices = @transform_2, window_bounds = array<i64: 1, 128>}, {transform_indices = @transform_3, window_bounds = array<i64: 128, 32>}, {pipeline_mode = #tpu.pipeline_mode<synchronous>, transform_indices = @transform_4, window_bounds = array<i64: 1, 32>}, {transform_indices = @transform_5, window_bounds = array<i64: 16, 32>}]} {
    %c0_i32 = arith.constant 0 : i32
    %0 = arith.cmpi eq, %arg1, %c0_i32 : i32
    %1 = arith.extui %0 : i1 to i32
    %c0_i32_0 = arith.constant 0 : i32
    %2 = arith.cmpi ne, %1, %c0_i32_0 : i32
    scf.if %2 {
      %cst_18 = arith.constant 0.000000e+00 : f32
      %25 = vector.broadcast %cst_18 : f32 to vector<16x32xf32>
      %c0_19 = arith.constant 0 : index
      %c0_20 = arith.constant 0 : index
      %26 = vector.load %arg7[%c0_19, %c0_20] : memref<16x32xf32, #tpu.memory_space<vmem>>, vector<16x32xf32>
      tpu.vector_store %arg7[%c0_19, %c0_20], %25 {strides = array<i32>} : memref<16x32xf32, #tpu.memory_space<vmem>>, vector<16x32xf32>,
    } else {
    }
    %c0 = arith.constant 0 : index
    %c0_1 = arith.constant 0 : index
    %3 = vector.load %arg2[%c0, %c0_1] : memref<16x32xf32, #tpu.memory_space<vmem>>, vector<16x32xf32>
    %c0_2 = arith.constant 0 : index
    %c0_3 = arith.constant 0 : index
    %4 = vector.load %arg3[%c0_2, %c0_3] : memref<32x128xf32, #tpu.memory_space<vmem>>, vector<32x128xf32>
    %cst = arith.constant dense<0.000000e+00> : vector<16x128xf32>
    %5 = tpu.matmul %3, %4, %cst {dimension_numbers = #tpu.dot_dimension_numbers<[1], [0], [0], [1], [0, 0, 1, 1], [], []>} : vector<16x32xf32>, vector<32x128xf32>, vector<16x128xf32> -> vector<16x128xf32>
    %c0_4 = arith.constant 0 : index
    %c0_5 = arith.constant 0 : index
    %6 = vector.load %arg4[%c0_4, %c0_5] : memref<1x128xf32, #tpu.memory_space<vmem>>, vector<1x128xf32>
    %7 = vector.broadcast %6 : vector<1x128xf32> to vector<16x128xf32>
    %8 = arith.addf %5, %7 : vector<16x128xf32>
    %cst_6 = arith.constant 5.000000e-01 : f32
    %9 = vector.broadcast %cst_6 : f32 to vector<16x128xf32>
    %10 = arith.mulf %9, %8 : vector<16x128xf32>
    %cst_7 = arith.constant 0.707106769 : f32
    %11 = vector.broadcast %cst_7 : f32 to vector<16x128xf32>
    %12 = arith.mulf %8, %11 : vector<16x128xf32>
    %13 = math.erf %12 : vector<16x128xf32>
    %cst_8 = arith.constant 1.000000e+00 : f32
    %14 = vector.broadcast %cst_8 : f32 to vector<16x128xf32>
    %15 = arith.addf %14, %13 : vector<16x128xf32>
    %16 = arith.mulf %10, %15 : vector<16x128xf32>
    %c0_9 = arith.constant 0 : index
    %c0_10 = arith.constant 0 : index
    %17 = vector.load %arg7[%c0_9, %c0_10] : memref<16x32xf32, #tpu.memory_space<vmem>>, vector<16x32xf32>
    %c0_11 = arith.constant 0 : index
    %c0_12 = arith.constant 0 : index
    %18 = vector.load %arg5[%c0_11, %c0_12] : memref<128x32xf32, #tpu.memory_space<vmem>>, vector<128x32xf32>
    %cst_13 = arith.constant dense<0.000000e+00> : vector<16x32xf32>
    %19 = tpu.matmul %16, %18, %cst_13 {dimension_numbers = #tpu.dot_dimension_numbers<[1], [0], [0], [1], [0, 0, 1, 1], [], []>} : vector<16x128xf32>, vector<128x32xf32>, vector<16x32xf32> -> vector<16x32xf32>
    %20 = arith.addf %17, %19 : vector<16x32xf32>
    %c0_14 = arith.constant 0 : index
    %c0_15 = arith.constant 0 : index
    %21 = vector.load %arg7[%c0_14, %c0_15] : memref<16x32xf32, #tpu.memory_space<vmem>>, vector<16x32xf32>
    tpu.vector_store %arg7[%c0_14, %c0_15], %20 {strides = array<i32>} : memref<16x32xf32, #tpu.memory_space<vmem>>, vector<16x32xf32>,
    %c0_i32_16 = arith.constant 0 : i32
    %22 = arith.cmpi eq, %arg1, %c0_i32_16 : i32
    %23 = arith.extui %22 : i1 to i32
    %c0_i32_17 = arith.constant 0 : i32
    %24 = arith.cmpi ne, %23, %c0_i32_17 : i32
    scf.if %24 {
      %c0_18 = arith.constant 0 : index
      %c0_19 = arith.constant 0 : index
      %25 = vector.load %arg7[%c0_18, %c0_19] : memref<16x32xf32, #tpu.memory_space<vmem>>, vector<16x32xf32>
      %c0_20 = arith.constant 0 : index
      %c0_21 = arith.constant 0 : index
      %26 = vector.load %arg6[%c0_20, %c0_21] : memref<1x32xf32, #tpu.memory_space<vmem>>, vector<1x32xf32>
      %27 = vector.broadcast %26 : vector<1x32xf32> to vector<16x32xf32>
      %28 = arith.addf %25, %27 : vector<16x32xf32>
      %c0_22 = arith.constant 0 : index
      %c0_23 = arith.constant 0 : index
      %29 = vector.load %arg7[%c0_22, %c0_23] : memref<16x32xf32, #tpu.memory_space<vmem>>, vector<16x32xf32>
      tpu.vector_store %arg7[%c0_22, %c0_23], %28 {strides = array<i32>} : memref<16x32xf32, #tpu.memory_space<vmem>>, vector<16x32xf32>,
    } else {
    }
    return
  }
  func.func @transform_0(%arg0: i32, %arg1: i32) -> (i32, i32) {
    %c0_i32 = arith.constant 0 : i32
    %c0_i32_0 = arith.constant 0 : i32
    return %arg0, %c0_i32 : i32, i32
  }
  func.func @transform_1(%arg0: i32, %arg1: i32) -> (i32, i32) {
    %c0_i32 = arith.constant 0 : i32
    %c0_i32_0 = arith.constant 0 : i32
    return %c0_i32, %arg1 : i32, i32
  }
  func.func @transform_2(%arg0: i32, %arg1: i32) -> (i32, i32) {
    %c0_i32 = arith.constant 0 : i32
    %c0_i32_0 = arith.constant 0 : i32
    return %c0_i32, %arg1 : i32, i32
  }
  func.func @transform_3(%arg0: i32, %arg1: i32) -> (i32, i32) {
    %c0_i32 = arith.constant 0 : i32
    %c0_i32_0 = arith.constant 0 : i32
    return %arg1, %c0_i32 : i32, i32
  }
  func.func @transform_4(%arg0: i32, %arg1: i32) -> (i32, i32) {
    %c0_i32 = arith.constant 0 : i32
    %c0_i32_0 = arith.constant 0 : i32
    %c0_i32_1 = arith.constant 0 : i32
    return %c0_i32, %c0_i32_0 : i32, i32
  }
  func.func @transform_5(%arg0: i32, %arg1: i32) -> (i32, i32) {
    %c0_i32 = arith.constant 0 : i32
    %c0_i32_0 = arith.constant 0 : i32
    return %arg0, %c0_i32 : i32, i32
  }
}

</mosaic_0001>

<bundles_post_ra>
// kernel: feed_forward.1
= control target key start
LH: loop header
LB: loop body
LE: loop exit
PB: predicated region body
PF: predicated region fallthrough
CT: control target
= control target key end

     0   :  { %vm25_vm0 = vcmask 261120   ;;  %s483_s0 = inlined_call_operand.vmem [shape: f32[16,32], index: 0, kind: input, shape index: {}]   ;;  %s484_s1 = inlined_call_operand.vmem [shape: f32[32,128], index: 1, kind: input, shape index: {}]   ;;  %s485_s2 = inlined_call_operand.vmem [shape: f32[1,128], index: 2, kind: input, shape index: {}]   ;;  %s486_s3 = inlined_call_operand.vmem [shape: f32[128,32], index: 3, kind: input, shape index: {}]   ;;  %s487_s4 = inlined_call_operand.vmem [shape: f32[1,32], index: 4, kind: input, shape index: {}]   ;;  %s488_s5 = inlined_call_operand.hbm [shape: f32[16,32], index: 5, kind: output, shape index: {}]  }
   0x1   :  { %v33_v0 = vld [vmem:[%s484_s1 + $0x18] sm:$0xff]  ;;  %v32_v1 = vld [vmem:[%s484_s1 + $0x10] sm:$0xff]  ;;  %v28_v2 = vld [vmem:[%s483_s0] sm:$0xff] }
   0x2   :  { %290 = vmatprep.subr.mxu0 %v33_v0  ;;  %v31_v3 = vld [vmem:[%s484_s1 + $0x8] sm:$0xff]  ;;  %298 = vmatprep.mubr.msk.f32.mxu0 %vm25_vm0, %v28_v2  ;;  %v150_v4 = vld [vmem:[%s486_s3 + $0x78] sm:$0xff]  ;;  %v149_v5 = vld [vmem:[%s486_s3 + $0x70] sm:$0xff] }
   0x3   :  { %291 = vmatpush3.msra.mxu0 %v33_v0  ;;  %301 = vmatprep.subr.mxu1 %v150_v4 }
   0x4   :  { %292 = vmatprep.subr.mxu0 %v32_v1 }
   0x5   :  { %10 = vsyncpa [#allocation3], 0  ;;  %293 = vmatpush3.msra.mxu0 %v32_v1  ;;  %v30_v6 = vld [vmem:[%s484_s1] sm:$0xff]  ;;  %302 = vmatpush3.msra.mxu1 %v150_v4  ;;  %v148_v7 = vld [vmem:[%s486_s3 + $0x68] sm:$0xff]  ;;  %v366_v22 = vmov 0.0   ;;  %s367_s11 = smov [#allocation2]  }
   0x6   :  { %294 = vmatprep.subr.mxu0 %v31_v3  ;;  %303 = vmatprep.subr.mxu1 %v149_v5  ;;  %v29_v8 = vld [vmem:[%s483_s0 + $0x8] sm:$0xff]  ;;  %v147_v9 = vld [vmem:[%s486_s3 + $0x60] sm:$0xff]  ;;  %v146_v10 = vld [vmem:[%s486_s3 + $0x58] sm:$0xff]  ;;  %27 = vst.msk [vmem:[#allocation2 + $0x8] sm:$0xff] %vm25_vm0, %v366_v22  ;;  %s251_s12 = sshll.u32 %s367_s11, 4  ;;  %s252_s12 = int_to_ptr.vmem [resolvable:$true] %s251_s12 }
   0x7   :  { %295 = vmatpush3.msra.mxu0 %v31_v3  ;;  %304 = vmatpush3.msra.mxu1 %v149_v5  ;;  %v145_v11 = vld [vmem:[%s486_s3 + $0x50] sm:$0xff]  ;;  %v144_v12 = vld [vmem:[%s486_s3 + $0x48] sm:$0xff]  ;;  %v143_v13 = vld [vmem:[%s486_s3 + $0x40] sm:$0xff]  ;;  %26 = vst.msk [vmem:[#allocation2] sm:$0xff] %vm25_vm0, %v366_v22  ;;  %s344_s13 = scalar_lea.vmem %s252_s12, 256  ;;  %p349_p1 = scmp.lt.s32.totalorder %s252_s12, %s252_s12 }
   0x8   :  { %296 = vmatprep.subr.mxu0 %v30_v6  ;;  %305 = vmatprep.subr.mxu1 %v148_v7  ;;  %v142_v14 = vld [vmem:[%s486_s3 + $0x38] sm:$0xff]  ;;  %v141_v15 = vld [vmem:[%s486_s3 + $0x30] sm:$0xff]  ;;  %v140_v16 = vld [vmem:[%s486_s3 + $0x28] sm:$0xff]  ;;  %p345_p0 = scmp.ne.s32.totalorder %s252_s12, %s344_s13  ;;  %p350_p2 = scmp.lt.s32.totalorder %s344_s13, %s344_s13 }
   0x9   :  { %297 = vmatpush3.msra.mxu0 %v30_v6  ;;  %306 = vmatpush3.msra.mxu1 %v148_v7  ;;  %v139_v17 = vld [vmem:[%s486_s3 + $0x20] sm:$0xff]  ;;  %v138_v18 = vld [vmem:[%s486_s3 + $0x18] sm:$0xff]  ;;  %v137_v19 = vld [vmem:[%s486_s3 + $0x10] sm:$0xff] }
   0xa   :  { %299 = vmatmul.mubr.msk.f32.vlgmr.msra.gmra.mxu0 %vm25_vm0, %v29_v8  ;;  %307 = vmatprep.subr.mxu1 %v147_v9  ;;  %v136_v20 = vld [vmem:[%s486_s3 + $0x8] sm:$0xff]  ;;  %v135_v21 = vld [vmem:[%s486_s3] sm:$0xff]  ;;  %p351_p3 = por %p350_p2, %p349_p1 }
   0xb   :  { %308 = vmatpush3.msra.mxu1 %v147_v9  ;;  %v262_v23 = vld [vmem:[%s485_s2] ss:$0 sm:$0xff] }
   0xc   :  { %309 = vmatprep.subr.mxu1 %v146_v10  ;;  %v265_v44 = vld [vmem:[%s487_s4] ss:$0 sm:$0xff]  ;;  %p352_p4 = pnand %p351_p3, %p345_p0 }
   0xd   :  { %310 = vmatpush3.msra.mxu1 %v146_v10  ;;  %v134_v38 = vld [vmem:[#allocation2 + $0x8] sm:$0xff] }
   0xe   :  { %311 = vmatprep.subr.mxu1 %v145_v11  ;;  %v133_v40 = vld [vmem:[#allocation2] sm:$0xff] }
   0xf   :  { %312 = vmatpush3.msra.mxu1 %v145_v11 }
  0x10   :  { %313 = vmatprep.subr.mxu1 %v144_v12 }
  0x11   :  { %314 = vmatpush3.msra.mxu1 %v144_v12 }
  0x12   :  { %315 = vmatprep.subr.mxu1 %v143_v13 }
  0x13   :  { %316 = vmatpush3.msra.mxu1 %v143_v13 }
  0x14   :  { %317 = vmatprep.subr.mxu1 %v142_v14 }
  0x15   :  { %318 = vmatpush3.msra.mxu1 %v142_v14 }
  0x16   :  { %319 = vmatprep.subr.mxu1 %v141_v15 }
  0x17   :  { %320 = vmatpush3.msra.mxu1 %v141_v15 }
  0x18   :  { %321 = vmatprep.subr.mxu1 %v140_v16 }
  0x19   :  { %322 = vmatpush3.msra.mxu1 %v140_v16 }
  0x1a   :  { %323 = vmatprep.subr.mxu1 %v139_v17 }
  0x1b   :  { %324 = vmatpush3.msra.mxu1 %v139_v17 }
  0x1c   :  { %325 = vmatprep.subr.mxu1 %v138_v18 }
  0x1d   :  { %326 = vmatpush3.msra.mxu1 %v138_v18 }
  0x1e   :  { %327 = vmatprep.subr.mxu1 %v137_v19 }
  0x1f   :  { %328 = vmatpush3.msra.mxu1 %v137_v19 }
  0x20   :  { %329 = vmatprep.subr.mxu1 %v136_v20 }
  0x21   :  { %330 = vmatpush3.msra.mxu1 %v136_v20 }
  0x22   :  { %331 = vmatprep.subr.mxu1 %v135_v21 }
  0x23   :  { %332 = vmatpush3.msra.mxu1 %v135_v21 }
  0xca   :  { %v300_v24 = vpop.f32.mrf.mxu0 }
  0xcb   :  { %v120_v25 = vadd.f32 %v300_v24, %v262_v23 }
  0xcc   :  { %v114_v26 = vpop.f32.mrf.mxu0 }
  0xcd   :  { %v126_v27 = vmul.f32 0.70710677, %v120_v25  ;;  %v115_v28 = vadd.f32 %v262_v23, %v114_v26  ;;  %v124_v35 = vmul.f32 0.5, %v120_v25 }
  0xcf   :  { %340 = verf.f32 %v126_v27  ;;  %v125_v29 = vmul.f32 0.70710677, %v115_v28  ;;  %v123_v33 = vmul.f32 0.5, %v115_v28 }
  0xd1   :  { %342 = verf.f32 %v125_v29 }
  0xdc   :  { %v341_v30 = vpop.eup %340 }
  0xdd   :  { %v130_v32 = vadd.f32 1.0, %v341_v30 }
  0xde   :  { %v343_v31 = vpop.eup %342 }
  0xdf   :  { %v129_v34 = vadd.f32 1.0, %v343_v31  ;;  %v132_v37 = vmul.f32 %v130_v32, %v124_v35 }
  0xe1   :  { %v131_v36 = vmul.f32 %v129_v34, %v123_v33 }
  0xe3   :  { %333 = vmatprep.mubr.f32.mxu1 %v131_v36 }
  0xe4   :  { %334 = vmatmul.mubr.f32.vlgmr.msra.gmra.mxu1 %v132_v37 }
 0x1a4   :  { %v335_v39 = vpop.f32.mrf.mxu1 }
 0x1a5   :  { %v227_v41 = vadd.f32 %v335_v39, %v134_v38 }
 0x1a6   :  { %v217_v42 = vpop.f32.mrf.mxu1 }
 0x1a7   :  { %229 = vst.msk [vmem:[#allocation2 + $0x8] sm:$0xff] %vm25_vm0, %v227_v41  ;;  %v226_v43 = vadd.f32 %v217_v42, %v133_v40 }
 0x1a9   :  { %228 = vst.msk [vmem:[#allocation2] sm:$0xff] %vm25_vm0, %v226_v43 }
 0x1ae   :  { %v234_v45 = vld [vmem:[#allocation2 + $0x8] sm:$0xff] }
 0x1af   :  { %v243_v46 = vadd.f32 %v265_v44, %v234_v45 }
 0x1b0   :  { %v233_v47 = vld [vmem:[#allocation2] sm:$0xff] }
 0x1b1   :  { %v242_v48 = vadd.f32 %v265_v44, %v233_v47  ;;  %245 = vst.msk [vmem:[#allocation2 + $0x8] sm:$0xff] %vm25_vm0, %v243_v46 }
 0x1b3   :  { %244 = vst.msk [vmem:[#allocation2] sm:$0xff] %vm25_vm0, %v242_v48 }
 0x1b4   :  { %355 = shalt.err (!%p352_p4)
}
 0x1b5   :  { %s368_s0 = smov 128   ;;  %s369_s4 = smov 8  }
 0x1b6   :  { %257 = dma.vmem_to_hbm [thread:$0]  %s252_s12, 256, %s488_s5, [#allocation3], %s368_s0, %s368_s0, %s369_s4  }
 0x1b7   :  { %364 = dma.done.wait [#allocation3], 256  }
 0x1b8   :  { %365 = vsyncadd [#allocation3], 4294967040 }
 0x1b9   :  { %261 = vsyncpa [#allocation3], 1 }

</bundles_post_ra>
